<compile_context>
chip_gen: v5e
topology: v5e:2x2
jax: 0.10.0
libtpu: 0.0.40
codegen_flags: <defaults>
</compile_context>

<pallas_src>
import functools
import math

import jax
import jax.numpy as jnp
from jax import lax
from jax.experimental import pallas as pl
from jax.experimental.pallas import tpu as pltpu

LANE = 128      # lane width (last dim granularity)
SUBLANE = 8     # sublane granularity (second-to-last dim, f32)


def _round_up(n, m):
    return ((n + m - 1) // m) * m


# ------------------------------ fused kernel -------------------------------- #

def _make_fused_mlp_kernel(n_hidden, true_hidden_dims, *, eps, activation, batch_norm):
    """Build a kernel whose body statically unrolls all layers.

    Ref order: x, [w, b (, gamma, beta)] per hidden layer, w_last, b_last, out.
    All feature dims are pre-padded to multiples of 128; padded weight rows /
    cols, biases, gammas and betas are zero.
    """

    def kernel(*refs):
        x_ref = refs[0]
        o_ref = refs[-1]
        idx = 1

        h = x_ref[...].astype(jnp.float32)

        for layer in range(n_hidden):
            if batch_norm:
                w_ref, b_ref, g_ref, be_ref = refs[idx:idx + 4]
                idx += 4
            else:
                w_ref, b_ref = refs[idx:idx + 2]
                idx += 2

            # NOTE: f32 MXU inputs kept for exact parity with the f32 reference
            # (bf16 cast is a v6e/v7x throughput option at larger sizes).
            y = jnp.dot(h, w_ref[...], preferred_element_type=jnp.float32)
            y = y + b_ref[...]                      # (1, P) broadcast over rows

            # TODO(synk): training-mode Dropout (stochastic masking via
            # pltpu.prng_random_bits) intentionally not emitted; eval = identity.

            if activation:
                y = jnp.maximum(y, 0.0)             # ReLU

            if batch_norm:
                # One-pass LayerNorm over the TRUE feature dim. Padded lanes are
                # exactly zero, so full-lane sums equal true-lane sums; divide
                # by the true dim, not the padded 128.
                inv_d = 1.0 / float(true_hidden_dims[layer])
                s = jnp.sum(y, axis=-1, keepdims=True)
                ss = jnp.sum(y * y, axis=-1, keepdims=True)
                mean = s * inv_d
                var = jnp.maximum(ss * inv_d - mean * mean, 0.0)
                y = (y - mean) * lax.rsqrt(var + eps)
                # Padded gamma/beta are zero -> pad lanes return to exactly 0.
                y = y * g_ref[...] + be_ref[...]

            h = y

        # Output layer (no dropout / relu / layernorm).
        w_ref, b_ref = refs[idx:idx + 2]
        y = jnp.dot(h, w_ref[...], preferred_element_type=jnp.float32) + b_ref[...]
        o_ref[...] = y.astype(o_ref.dtype)

    return kernel


# --------------------------------- wrapper ---------------------------------- #

def mlp_forward(params, x, *, eps=1e-5, activation=True, batch_norm=True, tile_b=None):
    """Runs the whole MLP in a single pallas_call. Pads lanes to 128 and the
    batch to the sublane/tile granularity, then slices the result back."""
    B, in_dim = x.shape
    n_layers = len(params)
    n_hidden = n_layers - 1
    out_dim = params[-1]["w"].shape[1]

    # Padded feature dims per boundary: [in, hidden..., out]
    p_dims = [_round_up(in_dim, LANE)]
    true_hidden = []
    for p in params[:-1]:
        true_hidden.append(p["w"].shape[1])
        p_dims.append(_round_up(p["w"].shape[1], LANE))
    p_dims.append(_round_up(out_dim, LANE))
    p_in, p_out = p_dims[0], p_dims[-1]

    # Batch padding / tiling.
    if tile_b is None:
        tile_b = min(_round_up(B, SUBLANE), 256)
    B_pad = _round_up(_round_up(B, SUBLANE), tile_b)

    x_p = jnp.zeros((B_pad, p_in), jnp.float32).at[:B, :in_dim].set(x)

    inputs = [x_p]
    in_specs = [pl.BlockSpec((tile_b, p_in), lambda i: (i, 0))]

    def _const_spec(rows, cols):
        return pl.BlockSpec((rows, cols), lambda i: (0, 0))

    for li, p in enumerate(params):
        rin, rout = p["w"].shape
        pin_l, pout_l = p_dims[li], p_dims[li + 1]
        w_p = jnp.zeros((pin_l, pout_l), jnp.float32).at[:rin, :rout].set(p["w"])
        b_p = jnp.zeros((1, pout_l), jnp.float32).at[0, :rout].set(p["b"])
        inputs += [w_p, b_p]
        in_specs += [_const_spec(pin_l, pout_l), _const_spec(1, pout_l)]
        if li != n_layers - 1 and batch_norm:
            g_p = jnp.zeros((1, pout_l), jnp.float32).at[0, :rout].set(p["gamma"])
            be_p = jnp.zeros((1, pout_l), jnp.float32).at[0, :rout].set(p["beta"])
            inputs += [g_p, be_p]
            in_specs += [_const_spec(1, pout_l), _const_spec(1, pout_l)]

    kernel = _make_fused_mlp_kernel(
        n_hidden, true_hidden, eps=eps, activation=activation, batch_norm=batch_norm)

    out_p = pl.pallas_call(
        kernel,
        out_shape=jax.ShapeDtypeStruct((B_pad, p_out), jnp.float32),
        grid=(B_pad // tile_b,),
        in_specs=in_specs,
        out_specs=pl.BlockSpec((tile_b, p_out), lambda i: (i, 0)),
        compiler_params=pltpu.CompilerParams(
            dimension_semantics=("parallel",)),  # batch tiles shard across TCs (v7x)
    )(*inputs)

    return out_p[:B, :out_dim]


# --------------------------- Parameter init / model ------------------------- #

def init_mlp_params(key, hidden_size_list, input_dim, output_dim, *, batch_norm=True):
    """Deterministic init mimicking nn.Linear default (Kaiming-uniform-ish) and
    nn.LayerNorm default (gamma=1, beta=0)."""
    dims = [input_dim] + list(hidden_size_list) + [output_dim]
    params = []
    for i in range(len(dims) - 1):
        fan_in, fan_out = dims[i], dims[i + 1]
        key, kw, kb = jax.random.split(key, 3)
        bound = 1.0 / math.sqrt(fan_in)
        # stored as [in, out] (transposed vs PyTorch's [out, in])
        w = jax.random.uniform(kw, (fan_in, fan_out), jnp.float32, -bound, bound)
        b = jax.random.uniform(kb, (fan_out,), jnp.float32, -bound, bound)
        is_last = i == len(dims) - 2
        layer = {"w": w, "b": b}
        if not is_last and batch_norm:
            layer["gamma"] = jnp.ones((fan_out,), jnp.float32)
            layer["beta"] = jnp.zeros((fan_out,), jnp.float32)
        params.append(layer)
    return params


# ----------------------------- Pure-JAX reference --------------------------- #

def mlp_reference(params, h, *, eps=1e-5, activation=True, batch_norm=True):
    n = len(params)
    for i, p in enumerate(params):
        h = h @ p["w"] + p["b"]
        if i != n - 1:
            if activation:
                h = jnp.maximum(h, 0.0)
            if batch_norm:
                mean = jnp.mean(h, axis=-1, keepdims=True)
                var = jnp.mean(jnp.square(h - mean), axis=-1, keepdims=True)
                h = (h - mean) * lax.rsqrt(var + eps)
                h = h * p["gamma"] + p["beta"]
    return h


# ------------------------------------ main ---------------------------------- #

if __name__ == "__main__":
    key = jax.random.PRNGKey(0)
    k_params, k_x = jax.random.split(key)

    batch = 8
    input_dim = 32
    hidden_size_list = [64, 48]
    output_dim = 16

    params = init_mlp_params(k_params, hidden_size_list, input_dim, output_dim)
    x = jax.random.normal(k_x, (batch, input_dim), jnp.float32)

    fwd = jax.jit(lambda p, xx: mlp_forward(p, xx))
    out = jax.block_until_ready(fwd(params, x))

    ref = mlp_reference(params, x)
    assert out.shape == (batch, output_dim), out.shape
    assert jnp.allclose(out, ref, atol=1e-4, rtol=1e-4), "mismatch vs reference"

    print("KERNEL_OK")
</pallas_src>

<mosaic_0001>
module attributes {stable_mosaic.version = 11 : i64} {
  func.func @kernel(%arg0: i32, %arg1: memref<8x128xf32, #tpu.memory_space<vmem>>, %arg2: memref<128x128xf32, #tpu.memory_space<vmem>>, %arg3: memref<1x128xf32, #tpu.memory_space<vmem>>, %arg4: memref<1x128xf32, #tpu.memory_space<vmem>>, %arg5: memref<1x128xf32, #tpu.memory_space<vmem>>, %arg6: memref<128x128xf32, #tpu.memory_space<vmem>>, %arg7: memref<1x128xf32, #tpu.memory_space<vmem>>, %arg8: memref<1x128xf32, #tpu.memory_space<vmem>>, %arg9: memref<1x128xf32, #tpu.memory_space<vmem>>, %arg10: memref<128x128xf32, #tpu.memory_space<vmem>>, %arg11: memref<1x128xf32, #tpu.memory_space<vmem>>, %arg12: memref<8x128xf32, #tpu.memory_space<vmem>>) attributes {dimension_semantics = [#tpu.dimension_semantics<parallel>], iteration_bounds = array<i64: 1>, scalar_prefetch = 0 : i64, scratch_operands = 0 : i64, tpu.core_type = #tpu.core_type<tc>, window_params = [{transform_indices = @transform_0, window_bounds = array<i64: 8, 128>}, {pipeline_mode = #tpu.pipeline_mode<synchronous>, transform_indices = @transform_1, window_bounds = array<i64: 128, 128>}, {pipeline_mode = #tpu.pipeline_mode<synchronous>, transform_indices = @transform_2, window_bounds = array<i64: 1, 128>}, {pipeline_mode = #tpu.pipeline_mode<synchronous>, transform_indices = @transform_3, window_bounds = array<i64: 1, 128>}, {pipeline_mode = #tpu.pipeline_mode<synchronous>, transform_indices = @transform_4, window_bounds = array<i64: 1, 128>}, {pipeline_mode = #tpu.pipeline_mode<synchronous>, transform_indices = @transform_5, window_bounds = array<i64: 128, 128>}, {pipeline_mode = #tpu.pipeline_mode<synchronous>, transform_indices = @transform_6, window_bounds = array<i64: 1, 128>}, {pipeline_mode = #tpu.pipeline_mode<synchronous>, transform_indices = @transform_7, window_bounds = array<i64: 1, 128>}, {pipeline_mode = #tpu.pipeline_mode<synchronous>, transform_indices = @transform_8, window_bounds = array<i64: 1, 128>}, {pipeline_mode = #tpu.pipeline_mode<synchronous>, transform_indices = @transform_9, window_bounds = array<i64: 128, 128>}, {pipeline_mode = #tpu.pipeline_mode<synchronous>, transform_indices = @transform_10, window_bounds = array<i64: 1, 128>}, {transform_indices = @transform_11, window_bounds = array<i64: 8, 128>}]} {
    %c0 = arith.constant 0 : index
    %c0_0 = arith.constant 0 : index
    %0 = vector.load %arg1[%c0, %c0_0] : memref<8x128xf32, #tpu.memory_space<vmem>>, vector<8x128xf32>
    %c0_1 = arith.constant 0 : index
    %c0_2 = arith.constant 0 : index
    %1 = vector.load %arg2[%c0_1, %c0_2] : memref<128x128xf32, #tpu.memory_space<vmem>>, vector<128x128xf32>
    %cst = arith.constant dense<0.000000e+00> : vector<8x128xf32>
    %2 = tpu.matmul %0, %1, %cst {dimension_numbers = #tpu.dot_dimension_numbers<[1], [0], [0], [1], [0, 0, 1, 1], [], []>} : vector<8x128xf32>, vector<128x128xf32>, vector<8x128xf32> -> vector<8x128xf32>
    %c0_3 = arith.constant 0 : index
    %c0_4 = arith.constant 0 : index
    %3 = vector.load %arg3[%c0_3, %c0_4] : memref<1x128xf32, #tpu.memory_space<vmem>>, vector<1x128xf32>
    %4 = vector.broadcast %3 : vector<1x128xf32> to vector<8x128xf32>
    %5 = arith.addf %2, %4 : vector<8x128xf32>
    %cst_5 = arith.constant 0.000000e+00 : f32
    %6 = vector.broadcast %cst_5 : f32 to vector<8x128xf32>
    %7 = arith.maximumf %5, %6 : vector<8x128xf32>
    %cst_6 = arith.constant dense<0.000000e+00> : vector<8xf32>
    %8 = vector.multi_reduction <add>, %7, %cst_6 [1] : vector<8x128xf32> to vector<8xf32>
    %9 = vector.shape_cast %8 : vector<8xf32> to vector<8x1xf32>
    %10 = arith.mulf %7, %7 : vector<8x128xf32>
    %cst_7 = arith.constant dense<0.000000e+00> : vector<8xf32>
    %11 = vector.multi_reduction <add>, %10, %cst_7 [1] : vector<8x128xf32> to vector<8xf32>
    %12 = vector.shape_cast %11 : vector<8xf32> to vector<8x1xf32>
    %cst_8 = arith.constant 1.562500e-02 : f32
    %13 = vector.broadcast %cst_8 : f32 to vector<8x1xf32>
    %14 = arith.mulf %9, %13 : vector<8x1xf32>
    %cst_9 = arith.constant 1.562500e-02 : f32
    %15 = vector.broadcast %cst_9 : f32 to vector<8x1xf32>
    %16 = arith.mulf %12, %15 : vector<8x1xf32>
    %17 = arith.mulf %14, %14 : vector<8x1xf32>
    %18 = arith.subf %16, %17 : vector<8x1xf32>
    %cst_10 = arith.constant 0.000000e+00 : f32
    %19 = vector.broadcast %cst_10 : f32 to vector<8x1xf32>
    %20 = arith.maximumf %18, %19 : vector<8x1xf32>
    %21 = vector.broadcast %14 : vector<8x1xf32> to vector<8x128xf32>
    %22 = arith.subf %7, %21 : vector<8x128xf32>
    %cst_11 = arith.constant 9.99999974E-6 : f32
    %23 = vector.broadcast %cst_11 : f32 to vector<8x1xf32>
    %24 = arith.addf %20, %23 : vector<8x1xf32>
    %25 = math.rsqrt %24 : vector<8x1xf32>
    %26 = vector.broadcast %25 : vector<8x1xf32> to vector<8x128xf32>
    %27 = arith.mulf %22, %26 : vector<8x128xf32>
    %c0_12 = arith.constant 0 : index
    %c0_13 = arith.constant 0 : index
    %28 = vector.load %arg4[%c0_12, %c0_13] : memref<1x128xf32, #tpu.memory_space<vmem>>, vector<1x128xf32>
    %29 = vector.broadcast %28 : vector<1x128xf32> to vector<8x128xf32>
    %30 = arith.mulf %27, %29 : vector<8x128xf32>
    %c0_14 = arith.constant 0 : index
    %c0_15 = arith.constant 0 : index
    %31 = vector.load %arg5[%c0_14, %c0_15] : memref<1x128xf32, #tpu.memory_space<vmem>>, vector<1x128xf32>
    %32 = vector.broadcast %31 : vector<1x128xf32> to vector<8x128xf32>
    %33 = arith.addf %30, %32 : vector<8x128xf32>
    %c0_16 = arith.constant 0 : index
    %c0_17 = arith.constant 0 : index
    %34 = vector.load %arg6[%c0_16, %c0_17] : memref<128x128xf32, #tpu.memory_space<vmem>>, vector<128x128xf32>
    %cst_18 = arith.constant dense<0.000000e+00> : vector<8x128xf32>
    %35 = tpu.matmul %33, %34, %cst_18 {dimension_numbers = #tpu.dot_dimension_numbers<[1], [0], [0], [1], [0, 0, 1, 1], [], []>} : vector<8x128xf32>, vector<128x128xf32>, vector<8x128xf32> -> vector<8x128xf32>
    %c0_19 = arith.constant 0 : index
    %c0_20 = arith.constant 0 : index
    %36 = vector.load %arg7[%c0_19, %c0_20] : memref<1x128xf32, #tpu.memory_space<vmem>>, vector<1x128xf32>
    %37 = vector.broadcast %36 : vector<1x128xf32> to vector<8x128xf32>
    %38 = arith.addf %35, %37 : vector<8x128xf32>
    %cst_21 = arith.constant 0.000000e+00 : f32
    %39 = vector.broadcast %cst_21 : f32 to vector<8x128xf32>
    %40 = arith.maximumf %38, %39 : vector<8x128xf32>
    %cst_22 = arith.constant dense<0.000000e+00> : vector<8xf32>
    %41 = vector.multi_reduction <add>, %40, %cst_22 [1] : vector<8x128xf32> to vector<8xf32>
    %42 = vector.shape_cast %41 : vector<8xf32> to vector<8x1xf32>
    %43 = arith.mulf %40, %40 : vector<8x128xf32>
    %cst_23 = arith.constant dense<0.000000e+00> : vector<8xf32>
    %44 = vector.multi_reduction <add>, %43, %cst_23 [1] : vector<8x128xf32> to vector<8xf32>
    %45 = vector.shape_cast %44 : vector<8xf32> to vector<8x1xf32>
    %cst_24 = arith.constant 0.020833334 : f32
    %46 = vector.broadcast %cst_24 : f32 to vector<8x1xf32>
    %47 = arith.mulf %42, %46 : vector<8x1xf32>
    %cst_25 = arith.constant 0.020833334 : f32
    %48 = vector.broadcast %cst_25 : f32 to vector<8x1xf32>
    %49 = arith.mulf %45, %48 : vector<8x1xf32>
    %50 = arith.mulf %47, %47 : vector<8x1xf32>
    %51 = arith.subf %49, %50 : vector<8x1xf32>
    %cst_26 = arith.constant 0.000000e+00 : f32
    %52 = vector.broadcast %cst_26 : f32 to vector<8x1xf32>
    %53 = arith.maximumf %51, %52 : vector<8x1xf32>
    %54 = vector.broadcast %47 : vector<8x1xf32> to vector<8x128xf32>
    %55 = arith.subf %40, %54 : vector<8x128xf32>
    %cst_27 = arith.constant 9.99999974E-6 : f32
    %56 = vector.broadcast %cst_27 : f32 to vector<8x1xf32>
    %57 = arith.addf %53, %56 : vector<8x1xf32>
    %58 = math.rsqrt %57 : vector<8x1xf32>
    %59 = vector.broadcast %58 : vector<8x1xf32> to vector<8x128xf32>
    %60 = arith.mulf %55, %59 : vector<8x128xf32>
    %c0_28 = arith.constant 0 : index
    %c0_29 = arith.constant 0 : index
    %61 = vector.load %arg8[%c0_28, %c0_29] : memref<1x128xf32, #tpu.memory_space<vmem>>, vector<1x128xf32>
    %62 = vector.broadcast %61 : vector<1x128xf32> to vector<8x128xf32>
    %63 = arith.mulf %60, %62 : vector<8x128xf32>
    %c0_30 = arith.constant 0 : index
    %c0_31 = arith.constant 0 : index
    %64 = vector.load %arg9[%c0_30, %c0_31] : memref<1x128xf32, #tpu.memory_space<vmem>>, vector<1x128xf32>
    %65 = vector.broadcast %64 : vector<1x128xf32> to vector<8x128xf32>
    %66 = arith.addf %63, %65 : vector<8x128xf32>
    %c0_32 = arith.constant 0 : index
    %c0_33 = arith.constant 0 : index
    %67 = vector.load %arg10[%c0_32, %c0_33] : memref<128x128xf32, #tpu.memory_space<vmem>>, vector<128x128xf32>
    %cst_34 = arith.constant dense<0.000000e+00> : vector<8x128xf32>
    %68 = tpu.matmul %66, %67, %cst_34 {dimension_numbers = #tpu.dot_dimension_numbers<[1], [0], [0], [1], [0, 0, 1, 1], [], []>} : vector<8x128xf32>, vector<128x128xf32>, vector<8x128xf32> -> vector<8x128xf32>
    %c0_35 = arith.constant 0 : index
    %c0_36 = arith.constant 0 : index
    %69 = vector.load %arg11[%c0_35, %c0_36] : memref<1x128xf32, #tpu.memory_space<vmem>>, vector<1x128xf32>
    %70 = vector.broadcast %69 : vector<1x128xf32> to vector<8x128xf32>
    %71 = arith.addf %68, %70 : vector<8x128xf32>
    %c0_37 = arith.constant 0 : index
    %c0_38 = arith.constant 0 : index
    %72 = vector.load %arg12[%c0_37, %c0_38] : memref<8x128xf32, #tpu.memory_space<vmem>>, vector<8x128xf32>
    tpu.vector_store %arg12[%c0_37, %c0_38], %71 {strides = array<i32>} : memref<8x128xf32, #tpu.memory_space<vmem>>, vector<8x128xf32>,
    return
  }
  func.func @transform_0(%arg0: i32) -> (i32, i32) {
    %c0_i32 = arith.constant 0 : i32
    %c0_i32_0 = arith.constant 0 : i32
    return %arg0, %c0_i32 : i32, i32
  }
  func.func @transform_1(%arg0: i32) -> (i32, i32) {
    %c0_i32 = arith.constant 0 : i32
    %c0_i32_0 = arith.constant 0 : i32
    %c0_i32_1 = arith.constant 0 : i32
    return %c0_i32, %c0_i32_0 : i32, i32
  }
  func.func @transform_2(%arg0: i32) -> (i32, i32) {
    %c0_i32 = arith.constant 0 : i32
    %c0_i32_0 = arith.constant 0 : i32
    %c0_i32_1 = arith.constant 0 : i32
    return %c0_i32, %c0_i32_0 : i32, i32
  }
  func.func @transform_3(%arg0: i32) -> (i32, i32) {
    %c0_i32 = arith.constant 0 : i32
    %c0_i32_0 = arith.constant 0 : i32
    %c0_i32_1 = arith.constant 0 : i32
    return %c0_i32, %c0_i32_0 : i32, i32
  }
  func.func @transform_4(%arg0: i32) -> (i32, i32) {
    %c0_i32 = arith.constant 0 : i32
    %c0_i32_0 = arith.constant 0 : i32
    %c0_i32_1 = arith.constant 0 : i32
    return %c0_i32, %c0_i32_0 : i32, i32
  }
  func.func @transform_5(%arg0: i32) -> (i32, i32) {
    %c0_i32 = arith.constant 0 : i32
    %c0_i32_0 = arith.constant 0 : i32
    %c0_i32_1 = arith.constant 0 : i32
    return %c0_i32, %c0_i32_0 : i32, i32
  }
  func.func @transform_6(%arg0: i32) -> (i32, i32) {
    %c0_i32 = arith.constant 0 : i32
    %c0_i32_0 = arith.constant 0 : i32
    %c0_i32_1 = arith.constant 0 : i32
    return %c0_i32, %c0_i32_0 : i32, i32
  }
  func.func @transform_7(%arg0: i32) -> (i32, i32) {
    %c0_i32 = arith.constant 0 : i32
    %c0_i32_0 = arith.constant 0 : i32
    %c0_i32_1 = arith.constant 0 : i32
    return %c0_i32, %c0_i32_0 : i32, i32
  }
  func.func @transform_8(%arg0: i32) -> (i32, i32) {
    %c0_i32 = arith.constant 0 : i32
    %c0_i32_0 = arith.constant 0 : i32
    %c0_i32_1 = arith.constant 0 : i32
    return %c0_i32, %c0_i32_0 : i32, i32
  }
  func.func @transform_9(%arg0: i32) -> (i32, i32) {
    %c0_i32 = arith.constant 0 : i32
    %c0_i32_0 = arith.constant 0 : i32
    %c0_i32_1 = arith.constant 0 : i32
    return %c0_i32, %c0_i32_0 : i32, i32
  }
  func.func @transform_10(%arg0: i32) -> (i32, i32) {
    %c0_i32 = arith.constant 0 : i32
    %c0_i32_0 = arith.constant 0 : i32
    %c0_i32_1 = arith.constant 0 : i32
    return %c0_i32, %c0_i32_0 : i32, i32
  }
  func.func @transform_11(%arg0: i32) -> (i32, i32) {
    %c0_i32 = arith.constant 0 : i32
    %c0_i32_0 = arith.constant 0 : i32
    return %arg0, %c0_i32 : i32, i32
  }
}

</mosaic_0001>

<bundles_post_ra>
// kernel: _lambda_.1
= control target key start
LH: loop header
LB: loop body
LE: loop exit
PB: predicated region body
PF: predicated region fallthrough
CT: control target
= control target key end

     0   :  { %s515_s0 = inlined_call_operand.vmem [shape: f32[8,128], index: 0, kind: input, shape index: {}]   ;;  %s516_s1 = inlined_call_operand.vmem [shape: f32[128,128], index: 1, kind: input, shape index: {}]   ;;  %s517_s2 = inlined_call_operand.vmem [shape: f32[1,128], index: 2, kind: input, shape index: {}]   ;;  %s518_s3 = inlined_call_operand.vmem [shape: f32[1,128], index: 3, kind: input, shape index: {}]   ;;  %s519_s4 = inlined_call_operand.vmem [shape: f32[1,128], index: 4, kind: input, shape index: {}]   ;;  %s520_s5 = inlined_call_operand.vmem [shape: f32[128,128], index: 5, kind: input, shape index: {}]   ;;  %s521_s6 = inlined_call_operand.vmem [shape: f32[1,128], index: 6, kind: input, shape index: {}]   ;;  %s522_s7 = inlined_call_operand.vmem [shape: f32[1,128], index: 7, kind: input, shape index: {}]   ;;  %s523_s8 = inlined_call_operand.vmem [shape: f32[1,128], index: 8, kind: input, shape index: {}]   ;;  %s524_s9 = inlined_call_operand.vmem [shape: f32[128,128], index: 9, kind: input, shape index: {}]   ;;  %s525_s10 = inlined_call_operand.vmem [shape: f32[1,128], index: 10, kind: input, shape index: {}]   ;;  %s526_s11 = inlined_call_operand.hbm [shape: f32[8,128], index: 11, kind: output, shape index: {}]  }
   0x1   :  { %v55_v0 = vld [vmem:[%s516_s1 + $0x78] sm:$0xff]  ;;  %v54_v1 = vld [vmem:[%s516_s1 + $0x70] sm:$0xff]  ;;  %v53_v2 = vld [vmem:[%s516_s1 + $0x68] sm:$0xff] }
   0x2   :  { %60 = vmatpush.msra.mxu0 %v55_v0  ;;  %v52_v3 = vld [vmem:[%s516_s1 + $0x60] sm:$0xff]  ;;  %v51_v4 = vld [vmem:[%s516_s1 + $0x58] sm:$0xff]  ;;  %v50_v5 = vld [vmem:[%s516_s1 + $0x50] sm:$0xff] }
   0x4   :  { %61 = vmatpush.msra.mxu0 %v54_v1 }
   0x6   :  { %62 = vmatpush.msra.mxu0 %v53_v2 }
   0x8   :  { %63 = vmatpush.msra.mxu0 %v52_v3 }
   0x9   :  { %16 = vsyncpa [#allocation3], 0  ;;  %v49_v6 = vld [vmem:[%s516_s1 + $0x48] sm:$0xff]  ;;  %v48_v7 = vld [vmem:[%s516_s1 + $0x40] sm:$0xff]  ;;  %s283_s16 = smov [#allocation2]   ;;  %s236_s18 = sshll.u32 %s526_s11, 4  ;;  %s237_s18 = int_to_ptr.hbm [resolvable:$true] %s236_s18 }
   0xa   :  { %64 = vmatpush.msra.mxu0 %v51_v4  ;;  %v47_v8 = vld [vmem:[%s516_s1 + $0x38] sm:$0xff]  ;;  %v46_v9 = vld [vmem:[%s516_s1 + $0x30] sm:$0xff]  ;;  %v45_v10 = vld [vmem:[%s516_s1 + $0x28] sm:$0xff] }
   0xb   :  { %v44_v11 = vld [vmem:[%s516_s1 + $0x20] sm:$0xff]  ;;  %v43_v12 = vld [vmem:[%s516_s1 + $0x18] sm:$0xff]  ;;  %v42_v13 = vld [vmem:[%s516_s1 + $0x10] sm:$0xff] }
   0xc   :  { %65 = vmatpush.msra.mxu0 %v50_v5  ;;  %v41_v14 = vld [vmem:[%s516_s1 + $0x8] sm:$0xff]  ;;  %v40_v15 = vld [vmem:[%s516_s1] sm:$0xff]  ;;  %v129_v22 = vld [vmem:[%s520_s5 + $0x78] sm:$0xff]  ;;  %s234_s1 = sshll.u32 %s283_s16, 4  ;;  %s235_s1 = int_to_ptr.vmem [resolvable:$true] %s234_s1 }
   0xd   :  { %v39_v16 = vld [vmem:[%s515_s0] sm:$0xff]  ;;  %134 = vmatpush.msra.mxu1 %v129_v22  ;;  %v128_v23 = vld [vmem:[%s520_s5 + $0x70] sm:$0xff]  ;;  %v127_v24 = vld [vmem:[%s520_s5 + $0x68] sm:$0xff] }
   0xe   :  { %66 = vmatpush.msra.mxu0 %v49_v6  ;;  %v246_v17 = vld [vmem:[%s517_s2] ss:$0 sm:$0xff]  ;;  %v125_v26 = vld [vmem:[%s520_s5 + $0x58] sm:$0xff]  ;;  %v124_v27 = vld [vmem:[%s520_s5 + $0x50] sm:$0xff] }
   0xf   :  { %135 = vmatpush.msra.mxu1 %v128_v23  ;;  %v126_v25 = vld [vmem:[%s520_s5 + $0x60] sm:$0xff]  ;;  %v123_v28 = vld [vmem:[%s520_s5 + $0x48] sm:$0xff]  ;;  %v121_v30 = vld [vmem:[%s520_s5 + $0x38] sm:$0xff] }
  0x10   :  { %67 = vmatpush.msra.mxu0 %v48_v7  ;;  %v122_v29 = vld [vmem:[%s520_s5 + $0x40] sm:$0xff]  ;;  %v120_v31 = vld [vmem:[%s520_s5 + $0x30] sm:$0xff]  ;;  %v119_v32 = vld [vmem:[%s520_s5 + $0x28] sm:$0xff] }
  0x11   :  { %136 = vmatpush.msra.mxu1 %v127_v24  ;;  %v118_v33 = vld [vmem:[%s520_s5 + $0x20] sm:$0xff]  ;;  %v117_v34 = vld [vmem:[%s520_s5 + $0x18] sm:$0xff]  ;;  %v116_v36 = vld [vmem:[%s520_s5 + $0x10] sm:$0xff] }
  0x12   :  { %68 = vmatpush.msra.mxu0 %v47_v8  ;;  %v115_v37 = vld [vmem:[%s520_s5 + $0x8] sm:$0xff]  ;;  %v114_v39 = vld [vmem:[%s520_s5] sm:$0xff]  ;;  %v203_v0 = vld [vmem:[%s524_s9 + $0x78] sm:$0xff] }
  0x13   :  { %137 = vmatpush.msra.mxu1 %v126_v25  ;;  %v247_v53 = vld [vmem:[%s518_s3] ss:$0 sm:$0xff]  ;;  %208 = vmatpush.msra.mxu2 %v203_v0  ;;  %v202_v1 = vld [vmem:[%s524_s9 + $0x70] sm:$0xff]  ;;  %v201_v2 = vld [vmem:[%s524_s9 + $0x68] sm:$0xff] }
  0x14   :  { %69 = vmatpush.msra.mxu0 %v46_v9  ;;  %v248_v56 = vld [vmem:[%s519_s4] ss:$0 sm:$0xff]  ;;  %v199_v4 = vld [vmem:[%s524_s9 + $0x58] sm:$0xff]  ;;  %v198_v5 = vld [vmem:[%s524_s9 + $0x50] sm:$0xff] }
  0x15   :  { %138 = vmatpush.msra.mxu1 %v125_v26  ;;  %v249_v59 = vld [vmem:[%s521_s6] ss:$0 sm:$0xff]  ;;  %209 = vmatpush.msra.mxu2 %v202_v1  ;;  %v197_v6 = vld [vmem:[%s524_s9 + $0x48] sm:$0xff]  ;;  %v195_v8 = vld [vmem:[%s524_s9 + $0x38] sm:$0xff] }
  0x16   :  { %70 = vmatpush.msra.mxu0 %v45_v10  ;;  %v200_v3 = vld [vmem:[%s524_s9 + $0x60] sm:$0xff]  ;;  %v194_v9 = vld [vmem:[%s524_s9 + $0x30] sm:$0xff]  ;;  %v193_v10 = vld [vmem:[%s524_s9 + $0x28] sm:$0xff] }
  0x17   :  { %139 = vmatpush.msra.mxu1 %v124_v27  ;;  %210 = vmatpush.msra.mxu2 %v201_v2  ;;  %v196_v7 = vld [vmem:[%s524_s9 + $0x40] sm:$0xff] }
  0x18   :  { %71 = vmatpush.msra.mxu0 %v44_v11  ;;  %v192_v11 = vld [vmem:[%s524_s9 + $0x20] sm:$0xff] }
  0x19   :  { %140 = vmatpush.msra.mxu1 %v123_v28  ;;  %211 = vmatpush.msra.mxu2 %v200_v3 }
  0x1a   :  { %72 = vmatpush.msra.mxu0 %v43_v12  ;;  %v191_v12 = vld [vmem:[%s524_s9 + $0x18] sm:$0xff] }
  0x1b   :  { %141 = vmatpush.msra.mxu1 %v122_v29  ;;  %212 = vmatpush.msra.mxu2 %v199_v4 }
  0x1c   :  { %73 = vmatpush.msra.mxu0 %v42_v13 }
  0x1d   :  { %142 = vmatpush.msra.mxu1 %v121_v30  ;;  %213 = vmatpush.msra.mxu2 %v198_v5 }
  0x1e   :  { %74 = vmatpush.msra.mxu0 %v41_v14  ;;  %v190_v14 = vld [vmem:[%s524_s9 + $0x10] sm:$0xff] }
  0x1f   :  { %143 = vmatpush.msra.mxu1 %v120_v31  ;;  %214 = vmatpush.msra.mxu2 %v197_v6  ;;  %v250_v31 = vld [vmem:[%s522_s7] ss:$0 sm:$0xff] }
  0x20   :  { %75 = vmatpush.msra.mxu0 %v40_v15  ;;  %v189_v15 = vld [vmem:[%s524_s9 + $0x8] sm:$0xff] }
  0x21   :  { %76 = vmatmul.f32.vlgmr.msra.gmra.mxu0 %v39_v16  ;;  %144 = vmatpush.msra.mxu1 %v119_v32 }
  0x22   :  { %215 = vmatpush.msra.mxu2 %v196_v7 }
  0x23   :  { %145 = vmatpush.msra.mxu1 %v118_v33 }
  0x24   :  { %216 = vmatpush.msra.mxu2 %v195_v8 }
  0x25   :  { %146 = vmatpush.msra.mxu1 %v117_v34  ;;  %v251_v34 = vld [vmem:[%s523_s8] ss:$0 sm:$0xff] }
  0x26   :  { %217 = vmatpush.msra.mxu2 %v194_v9 }
  0x27   :  { %147 = vmatpush.msra.mxu1 %v116_v36 }
  0x28   :  { %218 = vmatpush.msra.mxu2 %v193_v10 }
  0x29   :  { %148 = vmatpush.msra.mxu1 %v115_v37  ;;  %v252_v37 = vld [vmem:[%s525_s10] ss:$0 sm:$0xff] }
  0x2a   :  { %219 = vmatpush.msra.mxu2 %v192_v11 }
  0x2b   :  { %149 = vmatpush.msra.mxu1 %v114_v39 }
  0x2c   :  { %220 = vmatpush.msra.mxu2 %v191_v12 }
  0x2e   :  { %221 = vmatpush.msra.mxu2 %v190_v14 }
  0x30   :  { %222 = vmatpush.msra.mxu2 %v189_v15 }
  0x9e   :  { %v77_v18 = vpop.f32.mrf.mxu0 }
  0x9f   :  { %v78_v19 = vadd.f32 %v246_v17, %v77_v18  ;;  %v188_v17 = vld [vmem:[%s524_s9] sm:$0xff] }
  0xa0   :  { %223 = vmatpush.msra.mxu2 %v188_v17 }
  0xa1   :  { %v80_v20 = vmax.f32 %v78_v19, 0.0 }
  0xa3   :  { %81 = vadd.xlane.f32.xlu0 %v80_v20  ;;  %v83_v21 = vmul.f32 %v80_v20, %v80_v20 }
  0xab   :  { %84 = vadd.xlane.f32.xlu0 %v83_v21 }
 0x116   :  { %v82_v35 = vpop.xlane.xlu0 %81 }
 0x117   :  { %v86_v38 = vmul.f32 0.015625, %v82_v35 }
 0x119   :  { %v88_v41 = vmul.f32 %v86_v38, %v86_v38  ;;  %v91_v52 = vsub.f32 %v80_v20, %v86_v38 }
 0x11e   :  { %v85_v40 = vpop.xlane.xlu0 %84 }
 0x11f   :  { %v87_v42 = vmul.f32 0.015625, %v85_v40 }
 0x121   :  { %v89_v43 = vsub.f32 %v87_v42, %v88_v41 }
 0x123   :  { %v90_v44 = vmax.f32 %v89_v43, 0.0 }
 0x125   :  { %v92_v45 = vadd.f32 1e-05, %v90_v44 }
 0x127   :  { %253 = vrsqrt.f32 %v92_v45  ;;  %vm99_vm1 = vweird.f32 %v92_v45 }
 0x12d   :  { %v254_v46 = vpop.eup %253 }
 0x12e   :  { %v94_v47 = vmul.f32 %v254_v46, %v92_v45  ;;  %vm100_vm0 = vweird.f32 %v254_v46 }
 0x12f   :  { %vm101_vm2 = vmor %vm99_vm1, %vm100_vm0 }
 0x130   :  { %v95_v48 = vmul.f32 %v254_v46, %v94_v47 }
 0x132   :  { %v96_v49 = vmul.f32 0.5, %v95_v48 }
 0x134   :  { %v97_v50 = vsub.f32 1.5, %v96_v49 }
 0x136   :  { %v98_v51 = vmul.f32 %v254_v46, %v97_v50 }
 0x138   :  { %v102_v54 = vsel %vm101_vm2, %v254_v46, %v98_v51 }
 0x139   :  { %v103_v55 = vmul.f32 %v102_v54, %v91_v52 }
 0x13b   :  { %v108_v57 = vmul.f32 %v247_v53, %v103_v55 }
 0x13d   :  { %v113_v58 = vadd.f32 %v248_v56, %v108_v57 }
 0x13f   :  { %150 = vmatmul.f32.vlgmr.msra.gmra.mxu1 %v113_v58 }
 0x1bc   :  { %v151_v60 = vpop.f32.mrf.mxu1 }
 0x1bd   :  { %v152_v61 = vadd.f32 %v249_v59, %v151_v60 }
 0x1bf   :  { %v154_v62 = vmax.f32 %v152_v61, 0.0 }
 0x1c1   :  { %155 = vadd.xlane.f32.xlu1 %v154_v62  ;;  %v157_v63 = vmul.f32 %v154_v62, %v154_v62 }
 0x1c9   :  { %158 = vadd.xlane.f32.xlu1 %v157_v63 }
 0x234   :  { %v156_v13 = vpop.xlane.xlu1 %155 }
 0x235   :  { %v160_v16 = vmul.f32 0.020833334, %v156_v13 }
 0x237   :  { %v162_v19 = vmul.f32 %v160_v16, %v160_v16  ;;  %v165_v30 = vsub.f32 %v154_v62, %v160_v16 }
 0x23c   :  { %v159_v18 = vpop.xlane.xlu1 %158 }
 0x23d   :  { %v161_v20 = vmul.f32 0.020833334, %v159_v18 }
 0x23f   :  { %v163_v21 = vsub.f32 %v161_v20, %v162_v19 }
 0x241   :  { %v164_v22 = vmax.f32 %v163_v21, 0.0 }
 0x243   :  { %v166_v23 = vadd.f32 1e-05, %v164_v22 }
 0x245   :  { %255 = vrsqrt.f32 %v166_v23  ;;  %vm173_vm4 = vweird.f32 %v166_v23 }
 0x24b   :  { %v256_v24 = vpop.eup %255 }
 0x24c   :  { %v168_v25 = vmul.f32 %v256_v24, %v166_v23  ;;  %vm174_vm3 = vweird.f32 %v256_v24 }
 0x24d   :  { %vm175_vm5 = vmor %vm173_vm4, %vm174_vm3 }
 0x24e   :  { %v169_v26 = vmul.f32 %v256_v24, %v168_v25 }
 0x250   :  { %v170_v27 = vmul.f32 0.5, %v169_v26 }
 0x252   :  { %v171_v28 = vsub.f32 1.5, %v170_v27 }
 0x254   :  { %v172_v29 = vmul.f32 %v256_v24, %v171_v28 }
 0x256   :  { %v176_v32 = vsel %vm175_vm5, %v256_v24, %v172_v29 }
 0x257   :  { %v177_v33 = vmul.f32 %v176_v32, %v165_v30 }
 0x259   :  { %v182_v35 = vmul.f32 %v250_v31, %v177_v33 }
 0x25b   :  { %v187_v36 = vadd.f32 %v251_v34, %v182_v35 }
 0x25d   :  { %224 = vmatmul.f32.vlgmr.msra.gmra.mxu2 %v187_v36 }
 0x2e0   :  { %v225_v38 = vpop.f32.mrf.mxu2 }
 0x2e1   :  { %v226_v39 = vadd.f32 %v252_v37, %v225_v38 }
 0x2e3   :  { %228 = vst [vmem:[#allocation2] sm:$0xff] %v226_v39 }
 0x2e4   :  { %239 = dma.vmem_to_hbm [thread:$0]  %s235_s1, 128, %s237_s18, [#allocation3]  }
 0x2e5   :  { %281 = dma.done.wait [#allocation3], 128  }
 0x2e6   :  { %282 = vsyncadd [#allocation3], 4294967168 }
 0x2e7   :  { %244 = vsyncpa [#allocation3], 1 }

</bundles_post_ra>
